<compile_context>
chip_gen: v5e
topology: v5e:2x2
jax: 0.10.0
libtpu: 0.0.40
codegen_flags: <defaults>
</compile_context>

<pallas_src>
import jax
import jax.numpy as jnp
from jax import lax
from jax.experimental import pallas as pl
from jax.experimental.pallas import tpu as pltpu

EMBED_DIMENSION = 128
EMBED_MAX_NORM = 1.0
_RENORM_EPS = 1e-7  # torch.embedding_renorm_ epsilon


def _skipgram_kernel(x_ref, w_ref, b_ref, o_ref, xs_ref):
    # x_ref : (TN, E)   gathered embeddings (f32); resident across vocab tiles
    # w_ref : (TV, E)   linear-weight tile (bf16); the streamed input
    # b_ref : (1, TV)   bias tile (f32)
    # o_ref : (TN, TV)  logits tile (out_dtype, default bf16)
    # xs_ref: (TN, E)   scratch: renormalized rows cast to the MXU input dtype

    @pl.when(pl.program_id(1) == 0)
    def _():
        # Embedding max_norm renorm (torch.embedding_renorm_ semantics),
        # computed once per row tile and reused for every vocab tile.
        x = x_ref[...].astype(jnp.float32)
        norm = jnp.sqrt(jnp.sum(x * x, axis=-1, keepdims=True))
        scale = jnp.where(norm > EMBED_MAX_NORM,
                          EMBED_MAX_NORM / (norm + _RENORM_EPS),
                          jnp.ones_like(norm))
        xs_ref[...] = (x * scale).astype(xs_ref.dtype)

    # Linear: x @ W^T + b. Contract on E directly against the (TV, E) weight
    # tile (no wrapper-side transpose) with f32 accumulation on the MXU.
    # TODO(synk): verify via bundle dump that Mosaic does not materialize a
    # VMEM transpose of the weight tile; if it does, pre-transpose lin_w to
    # (E, V) in HBM and stream (E, TV) blocks instead.
    y = lax.dot_general(xs_ref[...], w_ref[...],
                        dimension_numbers=(((1,), (1,)), ((), ())),
                        preferred_element_type=jnp.float32)
    o_ref[...] = (y + b_ref[...]).astype(o_ref.dtype)


def _largest_tile(total, align, cap):
    """Largest multiple of `align` that divides `total` and is <= cap."""
    t = (min(cap, total) // align) * align
    while t > align and total % t != 0:
        t -= align
    return max(t, align)


def _vmem_capacity_bytes():
    try:
        return int(pltpu.get_tpu_info().vmem_capacity_bytes)
    except Exception:
        return 64 * 1024 * 1024  # conservative (v7x-sized) fallback


def skipgram_forward(inputs_, emb_table, lin_w, lin_b, *,
                     max_tile_v=4096, max_tile_n=1024,
                     compute_dtype=jnp.bfloat16,
                     out_dtype=jnp.bfloat16,
                     weight_buffers=2):
    """inputs_: int32 (B, S); emb_table: (V, E); lin_w: (V, E) or bf16; lin_b: (V,)."""
    B, S = inputs_.shape
    V, E = emb_table.shape
    N = B * S
    assert E == EMBED_DIMENSION and E % 128 == 0
    assert N % 8 == 0 and V % 128 == 0

    # Generation-aware VMEM budget: v7x-class parts have 64 MiB/TC (and 2 TCs),
    # v5e/v6e have 128 MiB — use bigger tiles on the latter.
    vmem_cap = _vmem_capacity_bytes()
    small_vmem = vmem_cap <= 64 * 1024 * 1024 + 1
    vmem_budget = (24 if small_vmem else 48) * 1024 * 1024

    out_isz = jnp.dtype(out_dtype).itemsize
    w_isz = jnp.dtype(compute_dtype).itemsize

    align_n = 16 if N % 16 == 0 else 8
    tn = _largest_tile(N, align_n, max_tile_n)
    tile_v = _largest_tile(V, 128, max_tile_v)

    def vmem_bytes(tn_, tv_):
        return (2 * tn_ * E * 4                       # x block (f32), 2 buffers
                + tn_ * E * w_isz                     # renormed scratch
                + weight_buffers * tv_ * E * w_isz    # weight tile buffers
                + 2 * tv_ * 4                         # bias tile, 2 buffers
                + 2 * tn_ * tv_ * out_isz)            # output tile, 2 buffers

    while vmem_bytes(tn, tile_v) > vmem_budget and tile_v > 128:
        tile_v = _largest_tile(V, 128, tile_v - 128)
    while vmem_bytes(tn, tile_v) > vmem_budget and tn > align_n:
        tn = _largest_tile(N, align_n, tn - align_n)

    # Megacore guard (v7x has 2 TensorCores/chip): ensure the "parallel" rows
    # axis has >= 2 tiles so both cores get work; single-TC parts unaffected.
    if small_vmem and N // tn < 2 and N >= 2 * align_n:
        tn = _largest_tile(N, align_n, N // 2)

    usage = vmem_bytes(tn, tile_v)
    vmem_limit = int(min(2 * vmem_budget, max(int(usage * 1.5), 16 * 1024 * 1024)))
    vmem_limit = max(vmem_limit, usage + (1 << 20))

    # Glue: embedding row gather (renorm + matmul live in the kernel).
    # NOTE(perf review): gather fusion into the kernel is deprioritized — the
    # x round trip is <1-2% of HBM traffic at realistic vocab sizes.
    x = jnp.take(emb_table, inputs_.reshape(N), axis=0)            # (N, E) f32
    # Skip the weight cast if the caller already holds bf16 weights.
    w = lin_w if lin_w.dtype == compute_dtype else lin_w.astype(compute_dtype)
    b2 = lin_b.astype(jnp.float32).reshape(1, V)                   # (1, V) f32

    w_spec_kwargs = {}
    if weight_buffers != 2:
        w_spec_kwargs["pipeline_mode"] = pl.Buffered(weight_buffers)
    w_spec = pl.BlockSpec((tile_v, E), lambda i, j: (j, 0), **w_spec_kwargs)

    # TODO(synk): for training-style use, fuse the downstream softmax/CE into
    # the vocab loop (row-wise max/sum-exp in VMEM scratch) so the (N,V)
    # logits never round-trip to HBM.
    out = pl.pallas_call(
        _skipgram_kernel,
        out_shape=jax.ShapeDtypeStruct((N, V), out_dtype),
        grid_spec=pltpu.PrefetchScalarGridSpec(
            num_scalar_prefetch=0,
            grid=(N // tn, V // tile_v),
            in_specs=[
                pl.BlockSpec((tn, E), lambda i, j: (i, 0)),        # rows, resident over j
                w_spec,                                            # weight tile (streamed)
                pl.BlockSpec((1, tile_v), lambda i, j: (0, j)),    # bias tile
            ],
            out_specs=pl.BlockSpec((tn, tile_v), lambda i, j: (i, j)),
            scratch_shapes=[pltpu.VMEM((tn, E), compute_dtype)],
        ),
        compiler_params=pltpu.CompilerParams(
            # vocab axis carries the scratch reuse -> "arbitrary";
            # rows are independent -> "parallel" (megacore shards rows on v7x).
            dimension_semantics=("parallel", "arbitrary"),
            vmem_limit_bytes=vmem_limit,
        ),
    )(x, w, b2)

    return out.reshape(B, S, V)


def _reference_f32(inputs_, emb_table, lin_w, lin_b):
    x = jnp.take(emb_table, inputs_, axis=0)
    norm = jnp.linalg.norm(x, axis=-1, keepdims=True)
    scale = jnp.where(norm > EMBED_MAX_NORM,
                      EMBED_MAX_NORM / (norm + _RENORM_EPS), 1.0)
    x = x * scale
    return x @ lin_w.T + lin_b


def _reference_matched(inputs_, emb_table, lin_w, lin_b, compute_dtype, out_dtype):
    # Same math with the same bf16 casts as the kernel (tight numerical check).
    x = jnp.take(emb_table, inputs_, axis=0)
    norm = jnp.linalg.norm(x, axis=-1, keepdims=True)
    scale = jnp.where(norm > EMBED_MAX_NORM,
                      EMBED_MAX_NORM / (norm + _RENORM_EPS), 1.0)
    xs = (x * scale).astype(compute_dtype)
    y = lax.dot_general(xs, lin_w.astype(compute_dtype),
                        dimension_numbers=(((2,), (1,)), ((), ())),
                        preferred_element_type=jnp.float32)
    return (y + lin_b).astype(out_dtype)


if __name__ == "__main__":
    vocab_size = 512
    B, S = 2, 16  # N = 32 rows

    key = jax.random.PRNGKey(0)
    k_emb, k_w, k_b, k_in = jax.random.split(key, 4)

    # Deterministic parameter init (shapes from the module's __init__).
    emb_table = jax.random.normal(k_emb, (vocab_size, EMBED_DIMENSION),
                                  jnp.float32)                              # Embedding.weight
    lin_w = jax.random.normal(k_w, (vocab_size, EMBED_DIMENSION),
                              jnp.float32) * (1.0 / EMBED_DIMENSION ** 0.5)  # Linear.weight
    lin_b = jax.random.normal(k_b, (vocab_size,), jnp.float32) * 0.01        # Linear.bias

    inputs_ = jax.random.randint(k_in, (B, S), 0, vocab_size, jnp.int32)

    # Cast the static weights to bf16 once outside the forward path (the
    # wrapper skips the per-call cast when it sees bf16 weights).
    lin_w_bf16 = lin_w.astype(jnp.bfloat16)

    # Small tile caps here so the demo exercises both grid axes (2 x 2);
    # production defaults (max_tile_v=4096, max_tile_n=1024) apply at real sizes.
    out = skipgram_forward(inputs_, emb_table, lin_w_bf16, lin_b,
                           max_tile_v=256, max_tile_n=16)
    out = jax.block_until_ready(out)

    assert out.shape == (B, S, vocab_size)
    assert out.dtype == jnp.bfloat16

    out_f32 = out.astype(jnp.float32)

    ref_m = _reference_matched(inputs_, emb_table, lin_w, lin_b,
                               jnp.bfloat16, jnp.bfloat16).astype(jnp.float32)
    assert jnp.allclose(out_f32, ref_m, atol=1e-2, rtol=1e-2), \
        "mismatch vs bf16-matched reference"

    ref32 = _reference_f32(inputs_, emb_table, lin_w, lin_b)
    assert jnp.allclose(out_f32, ref32, atol=3e-2, rtol=3e-2), \
        "mismatch vs f32 reference"

    print("KERNEL_OK")
</pallas_src>

<mosaic_0001>
module attributes {stable_mosaic.version = 11 : i64} {
  func.func @_skipgram_kernel(%arg0: i32, %arg1: i32, %arg2: memref<16x128xf32, #tpu.memory_space<vmem>>, %arg3: memref<256x128xbf16, #tpu.memory_space<vmem>>, %arg4: memref<1x256xf32, #tpu.memory_space<vmem>>, %arg5: memref<16x256xbf16, #tpu.memory_space<vmem>>, %arg6: memref<16x128xbf16, #tpu.memory_space<vmem>>) attributes {dimension_semantics = [#tpu.dimension_semantics<parallel>, #tpu.dimension_semantics<arbitrary>], iteration_bounds = array<i64: 2, 2>, scalar_prefetch = 0 : i64, scratch_operands = 1 : i64, tpu.core_type = #tpu.core_type<tc>, window_params = [{transform_indices = @transform_0, window_bounds = array<i64: 16, 128>}, {transform_indices = @transform_1, window_bounds = array<i64: 256, 128>}, {transform_indices = @transform_2, window_bounds = array<i64: 1, 256>}, {transform_indices = @transform_3, window_bounds = array<i64: 16, 256>}]} {
    %c0_i32 = arith.constant 0 : i32
    %0 = arith.cmpi eq, %arg1, %c0_i32 : i32
    %1 = arith.extui %0 : i1 to i32
    %c0_i32_0 = arith.constant 0 : i32
    %2 = arith.cmpi ne, %1, %c0_i32_0 : i32
    scf.if %2 {
      %c0_8 = arith.constant 0 : index
      %c0_9 = arith.constant 0 : index
      %11 = vector.load %arg2[%c0_8, %c0_9] : memref<16x128xf32, #tpu.memory_space<vmem>>, vector<16x128xf32>
      %12 = arith.mulf %11, %11 : vector<16x128xf32>
      %cst_10 = arith.constant dense<0.000000e+00> : vector<16xf32>
      %13 = vector.multi_reduction <add>, %12, %cst_10 [1] : vector<16x128xf32> to vector<16xf32>
      %14 = vector.shape_cast %13 : vector<16xf32> to vector<16x1xf32>
      %15 = math.sqrt %14 : vector<16x1xf32>
      %cst_11 = arith.constant 1.000000e+00 : f32
      %16 = vector.broadcast %cst_11 : f32 to vector<16x1xf32>
      %17 = arith.cmpf ogt, %15, %16 : vector<16x1xf32>
      %cst_12 = arith.constant 1.000000e-07 : f32
      %18 = vector.broadcast %cst_12 : f32 to vector<16x1xf32>
      %19 = arith.addf %15, %18 : vector<16x1xf32>
      %cst_13 = arith.constant 1.000000e+00 : f32
      %20 = vector.broadcast %cst_13 : f32 to vector<16x1xf32>
      %21 = arith.divf %20, %19 : vector<16x1xf32>
      %cst_14 = arith.constant 1.000000e+00 : f32
      %22 = vector.broadcast %cst_14 : f32 to vector<16x1xf32>
      %23 = arith.select %17, %21, %22 : vector<16x1xi1>, vector<16x1xf32>
      %24 = vector.broadcast %23 : vector<16x1xf32> to vector<16x128xf32>
      %25 = arith.mulf %11, %24 : vector<16x128xf32>
      %26 = arith.truncf %25 : vector<16x128xf32> to vector<16x128xbf16>
      %c0_15 = arith.constant 0 : index
      %c0_16 = arith.constant 0 : index
      %27 = vector.load %arg6[%c0_15, %c0_16] : memref<16x128xbf16, #tpu.memory_space<vmem>>, vector<16x128xbf16>
      tpu.vector_store %arg6[%c0_15, %c0_16], %26 {strides = array<i32>} : memref<16x128xbf16, #tpu.memory_space<vmem>>, vector<16x128xbf16>,
    } else {
    }
    %c0 = arith.constant 0 : index
    %c0_1 = arith.constant 0 : index
    %3 = vector.load %arg6[%c0, %c0_1] : memref<16x128xbf16, #tpu.memory_space<vmem>>, vector<16x128xbf16>
    %c0_2 = arith.constant 0 : index
    %c0_3 = arith.constant 0 : index
    %4 = vector.load %arg3[%c0_2, %c0_3] : memref<256x128xbf16, #tpu.memory_space<vmem>>, vector<256x128xbf16>
    %cst = arith.constant dense<0.000000e+00> : vector<16x256xf32>
    %5 = tpu.matmul %3, %4, %cst {dimension_numbers = #tpu.dot_dimension_numbers<[1], [1], [0], [0], [0, 0, 1, 0], [], []>} : vector<16x128xbf16>, vector<256x128xbf16>, vector<16x256xf32> -> vector<16x256xf32>
    %c0_4 = arith.constant 0 : index
    %c0_5 = arith.constant 0 : index
    %6 = vector.load %arg4[%c0_4, %c0_5] : memref<1x256xf32, #tpu.memory_space<vmem>>, vector<1x256xf32>
    %7 = vector.broadcast %6 : vector<1x256xf32> to vector<16x256xf32>
    %8 = arith.addf %5, %7 : vector<16x256xf32>
    %9 = arith.truncf %8 : vector<16x256xf32> to vector<16x256xbf16>
    %c0_6 = arith.constant 0 : index
    %c0_7 = arith.constant 0 : index
    %10 = vector.load %arg5[%c0_6, %c0_7] : memref<16x256xbf16, #tpu.memory_space<vmem>>, vector<16x256xbf16>
    tpu.vector_store %arg5[%c0_6, %c0_7], %9 {strides = array<i32>} : memref<16x256xbf16, #tpu.memory_space<vmem>>, vector<16x256xbf16>,
    return
  }
  func.func @transform_0(%arg0: i32, %arg1: i32) -> (i32, i32) {
    %c0_i32 = arith.constant 0 : i32
    %c0_i32_0 = arith.constant 0 : i32
    return %arg0, %c0_i32 : i32, i32
  }
  func.func @transform_1(%arg0: i32, %arg1: i32) -> (i32, i32) {
    %c0_i32 = arith.constant 0 : i32
    %c0_i32_0 = arith.constant 0 : i32
    return %arg1, %c0_i32 : i32, i32
  }
  func.func @transform_2(%arg0: i32, %arg1: i32) -> (i32, i32) {
    %c0_i32 = arith.constant 0 : i32
    %c0_i32_0 = arith.constant 0 : i32
    return %c0_i32, %arg1 : i32, i32
  }
  func.func @transform_3(%arg0: i32, %arg1: i32) -> (i32, i32) {
    %c0_i32 = arith.constant 0 : i32
    return %arg0, %arg1 : i32, i32
  }
}

</mosaic_0001>

<bundles_post_ra>
// kernel: tpu_custom_call.1
= control target key start
LH: loop header
LB: loop body
LE: loop exit
PB: predicated region body
PF: predicated region fallthrough
CT: control target
= control target key end

     0   :  { %s1552_s0 = inlined_call_operand.hbm [shape: f32[32,128], index: 0, kind: input, shape index: {}]   ;;  %s1553_s1 = inlined_call_operand.hbm [shape: bf16[512,128], index: 1, kind: input, shape index: {}]   ;;  %s1554_s2 = inlined_call_operand.hbm [shape: f32[1,512], index: 2, kind: input, shape index: {}]   ;;  %s1555_s3 = inlined_call_operand.hbm [shape: bf16[32,512], index: 3, kind: output, shape index: {}]  }
   0x1   :  { %1570 = sst [smem:[#allocation26_spill]] %s1553_s1 }
   0x2   :  { %1571 = sst [smem:[#allocation27_spill]] %s1555_s3 }
   0x3   :  { %8 = vsyncpa [#allocation4], 0 }
   0x4   :  { %10 = vsyncpa [#allocation4 + $0x1], 0 }
   0x5   :  { %11 = vsyncpa [#allocation7], 0 }
   0x6   :  { %13 = vsyncpa [#allocation7 + $0x1], 0 }
   0x7   :  { %14 = vsyncpa [#allocation5], 0 }
   0x8   :  { %16 = vsyncpa [#allocation5 + $0x1], 0  ;;  %s1227_s12 = smov 0   ;;  %s1229_s13 = smov 0  }
   0x9   :  { %s1231_s14 = smov 0   ;;  %s1233_s15 = smov 0  }
   0xa   :  { %s1235_s16 = smov 0   ;;  %s1237_s17 = smov 0  }
   0xb   :  { %s1239_s18 = smov 0   ;;  %s1241_s19 = smov 0  }
   0xc   :  { %s1243_s20 = smov 0   ;;  %s1245_s21 = smov 0  }
   0xd   :  { %s1247_s22 = smov 0   ;;  %s1249_s23 = smov 0  }
   0xe   :  { %s1251_s24 = smov 0   ;;  %s1253_s25 = smov 0  }
   0xf LB: > { %1572 = sst [smem:[#allocation13_spill]] %s1146_s12  ;;  %s1296_s26 = sadd.s32 4294967295, %s1198_s25   ;;  %s1198_s25 = sphi %s1253_s25, %s22_s25   ;;  %s1194_s24 = sphi %s1251_s24, %s1626_s24   ;;  %s1190_s23 = sphi %s1249_s23, %s1625_s23   ;;  %s1186_s22 = sphi %s1247_s22, %s1624_s22   ;;  %s1182_s21 = sphi %s1245_s21, %s1623_s21   ;;  %s1178_s20 = sphi %s1243_s20, %s1614_s20   ;;  %s1174_s19 = sphi %s1241_s19, %s1622_s19   ;;  %s1170_s18 = sphi %s1239_s18, %s1621_s18   ;;  %s1166_s17 = sphi %s1237_s17, %s1620_s17   ;;  %s1162_s16 = sphi %s1235_s16, %s1619_s16   ;;  %s1158_s15 = sphi %s1233_s15, %s1618_s15   ;;  %s1154_s14 = sphi %s1231_s14, %s1611_s14   ;;  %s1150_s13 = sphi %s1229_s13, %s1610_s13   ;;  %s1146_s12 = sphi %s1227_s12, %s1609_s12  }
  0x10   : > { %1573 = sst [smem:[#allocation14_spill]] %s1150_s13  ;;  %s31_s27 = sadd.s32 1, %s1190_s23 }
  0x11   : > { %1574 = sst [smem:[#allocation15_spill]] %s1154_s14  ;;  %p1299_p0 = scmp.ge.s32.totalorder %s31_s27, 2 }
  0x12   : > { %1575 = sst [smem:[#allocation16_spill]] %s1178_s20  ;;  %p49_p1 = scmp.eq.s32.totalorder %s1198_s25, 0 }
  0x13   : > { %1576 = sst [smem:[#allocation17_spill]] %s1182_s21  ;;  %p55_p2 = scmp.eq.s32.totalorder %s1296_s26, 0 }
  0x14   : > { %1577 = sst [smem:[#allocation18_spill]] %s1186_s22  ;;  %s67_s29 = sadd.s32 1, %s1166_s17 }
  0x15   : > { %1578 = sst [smem:[#allocation19_spill]] %s1194_s24  ;;  %s1628_s27 = smov (%p1299_p0, %s31_s27), 0 }
  0x16   : > { %1580 = sst [smem:[#allocation20_spill]] %s1628_s27  ;;  %p74_p3 = scmp.ne.s32.totalorder %s1166_s17, %s1162_s16 }
  0x17   : > { %p80_p4 = scmp.ne.s32.totalorder %s1162_s16, %s1158_s15  ;;  %s1315_s30 = ssub.s32 %s1190_s23, %s1628_s27 }
  0x18   : > { %p65_p6 = scmp.eq.s32.totalorder %s1315_s30, 0  ;;  %p1321_p7 = por %p74_p3, %p49_p1 }
  0x19   : > { %p1327_p8 = por %p80_p4, %p55_p2  ;;  %p1559_p9 = scmp.lt.s32.totalorder %s1198_s25, 4 }
  0x1a   : > { %s1332_s6 = scalar_select %p65_p6, %s1166_s17, %s67_s29  }
  0x1b   : > { %s1582_s5 = scalar_select %p1327_p8, 1, 0 }
  0x1c   : > { %1584 = sst [smem:[#allocation22_spill]] %s1332_s6  ;;  %s180_s7 = sand.u32 1, %s1198_s25  }
  0x1d   : > { %1583 = sst [smem:[#allocation21_spill]] %s1582_s5  ;;  %s1558_s8 = sand.u32 1, %s1166_s17  }
  0x1e   : > { %s696_s9 = sshll.u32 %s1558_s8, 7  ;;  %s783_s10 = sshll.u32 %s1190_s23, 7 }
  0x1f   : > { %s1585_s1 = sld [smem:[#allocation26_spill]]  ;;  %s184_s22 = scalar_lea.vmem [#allocation6], %s696_s9 }
  0x20   : > { %s192_s29 = sshll.u32 %s184_s22, 4  ;;  %p1347_p10 = pnand %p1559_p9, %p1321_p7  ;;  %s193_s29 = int_to_ptr.vmem [resolvable:$true] %s192_s29 }
  0x21   : > { %p701_p11 = scmp.ge.s32.totalorder %s1198_s25, 1  ;;  %p219_p12 = scmp.lt.s32.totalorder %s1198_s25, 5 }
  0x22   : > { %s1200_s22 = smov 64   ;;  %s1201_s4 = smov 4  }
  0x23   : > { %p1358_p13 = pnand %p701_p11, %p219_p12  ;;  %s34_s11 = sadd.s32 1, %s1194_s24 }
  0x24   : > { %s41_s15 = sadd.s32 1, %s1178_s20  ;;  %s1630_s11 = smov (!%p1299_p0, %s34_s11), %s1194_s24 }
  0x25   : > { %s189_s27 = scalar_lea.hbm %s1585_s1, %s783_s10  ;;  %s690_s10 = sadd.s32 4294967294, %s1198_s25  }
  0x26   : > { %s190_s3 = sshll.u32 %s189_s27, 4  ;;  %s1353_s27 = scalar_lea.sflag [#allocation7], %s180_s7  ;;  %s191_s3 = int_to_ptr.hbm [resolvable:$true] %s190_s3 }
  0x27   : > { %821 = dma.hbm_to_vmem [thread:$0]  (!%p1347_p10), %s191_s3, 2048, %s193_s29, %s1353_s27, %s1200_s22, %s1200_s22, %s1201_s4  }
  0x28   : > { %p48_p3 = scmp.ne.s32.totalorder %s1178_s20, %s1174_s19  ;;  %p54_p4 = scmp.ne.s32.totalorder %s1174_s19, %s1170_s18 }
  0x29   : > { %p36_p6 = scmp.ge.s32.totalorder %s1630_s11, 2  ;;  %s121_s7 = sadd.s32 1, %s1154_s14 }
  0x2a   : > { %p1375_p7 = por %p49_p1, %p48_p3  ;;  %p1381_p11 = por %p55_p2, %p54_p4 }
  0x2b   : > { %s1632_s11 = smov (%p36_p6, %s1630_s11), 0  ;;  %p131_p0 = scmp.ne.s32.totalorder %s1154_s14, %s1150_s13 }
  0x2c   : > { %1590 = sst [smem:[#allocation23_spill]] %s1632_s11  ;;  %p137_p12 = scmp.ne.s32.totalorder %s1150_s13, %s1146_s12 }
  0x2d   : > { %s38_s18 = ssub.s32 %s1194_s24, %s1632_s11  ;;  %p138_p9 = scmp.eq.s32.totalorder %s690_s10, 3 }
  0x2e   : > { %p39_p5 = scmp.eq.s32.totalorder %s38_s18, 0  ;;  %s118_s28 = sor.u32 %s1315_s30, %s38_s18 }
  0x2f   : > { %p119_p1 = scmp.eq.s32.totalorder %s118_s28, 0  ;;  %p1591_p3 = scmp.eq.s32.totalorder %s1296_s26, 3 }
  0x30   : > { %s1401_s4 = scalar_select %p39_p5, %s1178_s20, %s41_s15  }
  0x31   : > { %p1396_p8 = por %p1591_p3, %p131_p0  ;;  %p1406_p2 = por %p138_p9, %p137_p12 }
  0x32   : > { %1593 = sst [smem:[#allocation24_spill]] %s1401_s4  ;;  %s158_s10 = sand.u32 1, %s1178_s20  }
  0x33   : > { %s1404_s1 = scalar_select %p119_p1, %s1154_s14, %s121_s7  }
  0x34   : > { %s693_s11 = sshll.u32 %s158_s10, 4  ;;  %s782_s12 = sshll.u32 %s1194_s24, 4 }
  0x35   : > { %1594 = sst [smem:[#allocation25_spill]] %s1404_s1  ;;  %s167_s28 = scalar_lea.hbm %s1552_s0, %s782_s12 }
  0x36   : > { %s162_s21 = scalar_lea.vmem [#allocation3], %s693_s11  ;;  %s168_s5 = sshll.u32 %s167_s28, 4  ;;  %s169_s5 = int_to_ptr.hbm [resolvable:$true] %s168_s5 }
  0x37   : > { %s170_s13 = sshll.u32 %s162_s21, 4  ;;  %p1596_p5 = scmp.lt.s32.totalorder %s1198_s25, 4  ;;  %s171_s13 = int_to_ptr.vmem [resolvable:$true] %s170_s13 }
  0x38   : > { %s1597_s15 = sand.u32 1, %s1166_s17   ;;  %s159_s4 = scalar_lea.sflag [#allocation4], %s158_s10 }
  0x39   : > { %p816_p9 = pnand %p1596_p5, %p1375_p7  ;;  %s699_s7 = sshll.u32 %s1597_s15, 1 }
  0x3a   : > { %s1202_s20 = smov 128   ;;  %s1203_s1 = smov 8  }
  0x3b   : > { %818 = dma.hbm_to_vmem [thread:$0]  (!%p816_p9), %s169_s5, 256, %s171_s13, %s159_s4, %s1202_s20, %s1202_s20, %s1203_s1  }
  0x3c   : > { %s700_s24 = sshll.u32 %s1190_s23, 1  ;;  %s206_s21 = scalar_lea.vmem [#allocation8], %s699_s7 }
  0x3d   : > { %s210_s12 = scalar_lea.hbm %s1554_s2, %s700_s24  ;;  %s214_s11 = sshll.u32 %s206_s21, 4  ;;  %s215_s11 = int_to_ptr.vmem [resolvable:$true] %s214_s11 }
  0x3e   : > { %s212_s18 = sshll.u32 %s210_s12, 4  ;;  %223 = sbr.rel (%p1358_p13) target bundleno = 472 (0x1d8), region = 32  ;;  %s213_s18 = int_to_ptr.hbm [resolvable:$true] %s212_s18 }
  0x3f   : > { %824 = dma.hbm_to_vmem [thread:$0]  (!%p1347_p10), %s213_s18, 32, %s215_s11, %s1353_s27  }
  0x40   : > { %s225_s3 = sand.u32 (!%p1358_p13), 1, %s1174_s19  }
  0x41   : > { %s702_s10 = sshll.u32 (!%p1358_p13), %s225_s3, 4  ;;  %s226_s1 = scalar_lea.sflag (!%p1358_p13), [#allocation4], %s225_s3 }
  0x42   : > { %s229_s13 = scalar_lea.vmem (!%p1358_p13), [#allocation3], %s702_s10 }
  0x43   : > { %1133 = dma.done.wait (%p1381_p11), %s226_s1, 256  }
  0x44   : > { %1135 = vsyncadd (%p1381_p11), %s226_s1, 4294967040  ;;  %s1598_s14 = sld [smem:[#allocation21_spill]]  ;;  %s235_s20 = sand.u32 1, %s1296_s26  }
  0x45   : > { %s237_s24 = sand.u32 1, %s1162_s16   ;;  %s236_s8 = scalar_lea.sflag [#allocation7], %s235_s20 }
  0x46   : > { %s703_s5 = sshll.u32 %s237_s24, 7 }
  0x47   : > { %s1437_s27 = scalar_lea.vmem [#allocation6], %s703_s5 }
  0x4a   : > { %p1599_p10 = scmp.ne.s32.totalorder %s1598_s14, 0 }
  0x4c   : > { %1137 = dma.done.wait (%p1599_p10), %s236_s8, 2080  }
  0x4d   : > { %1139 = vsyncadd (%p1599_p10), %s236_s8, 4294965216  ;;  %s1600_s9 = sld [smem:[#allocation14_spill]]  ;;  %s1443_s4 = sshll.u32 %s237_s24, 1 }
  0x4e   : > { %s249_s15 = scalar_lea.vmem [#allocation8], %s1443_s4  ;;  %s1601_s7 = sld [smem:[#allocation17_spill]] }
  0x53   : > { %s280_s29 = sand.u32 1, %s1600_s9  }
  0x54   : > { %s705_s28 = sshll.u32 %s280_s29, 4  ;;  %p706_p13 = scmp.ne.s32.totalorder %s1601_s7, 0 }
  0x55   : > { %s1449_s26 = scalar_lea.vmem [#allocation9], %s705_s28 }
  0x56   : > { %291 = sbr.rel (%p706_p13) target bundleno = 264 (0x108), region = 48 }
  0x5b   : > { %v1452_v0 = vld [vmem:[%s229_s13] sm:$0xff]  ;;  %v1456_v2 = vld [vmem:[%s229_s13 + $0x8] sm:$0xff] }
  0x5c   : > { %v294_v1 = vmul.f32 %v1452_v0, %v1452_v0  ;;  %v295_v3 = vmul.f32 %v1456_v2, %v1456_v2 }
  0x5e   : > { %296 = vadd.xlane.f32.xlu0 %v294_v1 }
  0x66   : > { %298 = vadd.xlane.f32.xlu0 %v295_v3 }
  0xd1   : > { %v297_v4 = vpop.xlane.xlu0 %296 }
  0xd2   : > { %950 = vrsqrt.f32 %v297_v4  ;;  %vm307_vm0 = vcmp.eq.f32.partialorder %v297_v4, inf  ;;  %v310_v16 = vand.u32 2147483648, %v297_v4  ;;  %vm309_vm1 = vcmp.eq.f32.partialorder %v297_v4, 0.0 }
  0xd8   : > { %v951_v5 = vpop.eup %950 }
  0xd9   : > { %v301_v6 = vmul.f32 %v951_v5, %v297_v4  ;;  %v299_v7 = vpop.xlane.xlu0 %298 }
  0xda   : > { %952 = vrsqrt.f32 %v299_v7  ;;  %vm319_vm2 = vcmp.eq.f32.partialorder %v299_v7, inf  ;;  %v322_v24 = vand.u32 2147483648, %v299_v7  ;;  %vm321_vm3 = vcmp.eq.f32.partialorder %v299_v7, 0.0 }
  0xdb   : > { %v302_v8 = vmul.f32 %v951_v5, %v301_v6 }
  0xdd   : > { %v303_v9 = vmul.f32 0.5, %v302_v8 }
  0xdf   : > { %v304_v10 = vsub.f32 1.5, %v303_v9 }
  0xe0   : > { %v953_v11 = vpop.eup %952 }
  0xe1   : > { %v305_v12 = vmul.f32 %v951_v5, %v304_v10  ;;  %v313_v13 = vmul.f32 %v953_v11, %v299_v7 }
  0xe3   : > { %v306_v14 = vmul.f32 %v305_v12, %v297_v4  ;;  %v314_v15 = vmul.f32 %v953_v11, %v313_v13 }
  0xe5   : > { %v308_v17 = vsel %vm307_vm0, %v297_v4, %v306_v14  ;;  %v315_v18 = vmul.f32 0.5, %v314_v15 }
  0xe6   : > { %v311_v19 = vsel %vm309_vm1, %v310_v16, %v308_v17 }
  0xe7   : > { %v326_v20 = vadd.f32 1e-07, %v311_v19  ;;  %v316_v21 = vsub.f32 1.5, %v315_v18  ;;  %vm324_vm10 = vcmp.gt.f32.partialorder %v311_v19, 1.0 }
  0xe9   : > { %954 = vrcp.f32 %v326_v20  ;;  %v317_v22 = vmul.f32 %v953_v11, %v316_v21  ;;  %v339_v34 = vand.u32 2147483648, %v326_v20  ;;  %vm333_vm5 = vweird.f32 %v326_v20 }
  0xea   : > { %v337_v35 = vand.u32 2147483647, %v326_v20 }
  0xeb   : > { %v318_v23 = vmul.f32 %v317_v22, %v299_v7  ;;  %v340_v39 = vor.u32 1.1754944e-38, %v339_v34 }
  0xec   : > { %vm338_vm7 = vcmp.eq.f32.partialorder %v337_v35, 8.507059e+37 }
  0xed   : > { %v320_v25 = vsel %vm319_vm2, %v299_v7, %v318_v23 }
  0xee   : > { %v323_v27 = vsel %vm321_vm3, %v322_v24, %v320_v25 }
  0xef   : > { %v955_v26 = vpop.eup %954  ;;  %v327_v29 = vadd.f32 1e-07, %v323_v27  ;;  %vm325_vm13 = vcmp.gt.f32.partialorder %v323_v27, 1.0 }
  0xf0   : > { %v329_v28 = vmul.f32 %v955_v26, %v326_v20  ;;  %vm334_vm4 = vweird.f32 %v955_v26 }
  0xf1   : > { %956 = vrcp.f32 %v327_v29  ;;  %vm335_vm6 = vmor %vm333_vm5, %vm334_vm4  ;;  %v354_v40 = vand.u32 2147483648, %v327_v29  ;;  %v352_v42 = vand.u32 2147483647, %v327_v29  ;;  %vm348_vm9 = vweird.f32 %v327_v29 }
  0xf2   : > { %v330_v30 = vsub.f32 1.0, %v329_v28 }
  0xf3   : > { %v355_v45 = vor.u32 1.1754944e-38, %v354_v40  ;;  %vm353_vm12 = vcmp.eq.f32.partialorder %v352_v42, 8.507059e+37 }
  0xf4   : > { %v331_v31 = vmul.f32 %v955_v26, %v330_v30 }
  0xf6   : > { %v332_v32 = vadd.f32 %v955_v26, %v331_v31 }
  0xf7   : > { %v957_v33 = vpop.eup %956 }
  0xf8   : > { %v344_v36 = vmul.f32 %v957_v33, %v327_v29  ;;  %v336_v37 = vsel %vm335_vm6, %v955_v26, %v332_v32  ;;  %vm349_vm8 = vweird.f32 %v957_v33 }
  0xf9   : > { %v341_v43 = vsel %vm338_vm7, %v340_v39, %v336_v37  ;;  %vm350_vm11 = vmor %vm348_vm9, %vm349_vm8 }
  0xfa   : > { %v345_v38 = vsub.f32 1.0, %v344_v36  ;;  %v358_v46 = vsel %vm324_vm10, %v341_v43, 1.0 }
  0xfb   : > { %v360_v50 = vmul.f32 %v358_v46, %v1452_v0 }
  0xfc   : > { %v346_v41 = vmul.f32 %v957_v33, %v345_v38 }
  0xfe   : > { %v347_v44 = vadd.f32 %v957_v33, %v346_v41 }
 0x100   : > { %v351_v47 = vsel %vm350_vm11, %v957_v33, %v347_v44 }
 0x101   : > { %v356_v48 = vsel %vm353_vm12, %v355_v45, %v351_v47 }
 0x102   : > { %v359_v49 = vsel %vm325_vm13, %v356_v48, 1.0 }
 0x103   : > { %v361_v51 = vmul.f32 %v359_v49, %v1456_v2 }
 0x105   : > { %v805_v52 = vpack.c.bf16 %v361_v51, %v360_v50 }
 0x107   : > { %806 = vst [vmem:[#allocation2] sm:$0xff] %v805_v52  }
 0x108 PF: > { %v792_v53 = vld [vmem:[%s1437_s27 + $0x38] sm:$0xff]  ;;  %v791_v55 = vld [vmem:[%s1437_s27 + $0x30] sm:$0xff]  ;;  %v790_v57 = vld [vmem:[%s1437_s27 + $0x28] sm:$0xff]  ;;  %s1602_s30 = sld [smem:[#allocation17_spill]]  ;;  %s556_s24 = sshll.u32 %s1449_s26, 4  ;;  %s557_s24 = int_to_ptr.vmem [resolvable:$true] %s556_s24 }
 0x109   : > { %v800_v54 = vld [vmem:[%s1437_s27 + $0x78] sm:$0xff]  ;;  %508 = vmatpush.bf16.xpose.msra.mxu0 %v792_v53  ;;  %v799_v56 = vld [vmem:[%s1437_s27 + $0x70] sm:$0xff]  ;;  %v798_v58 = vld [vmem:[%s1437_s27 + $0x68] sm:$0xff]  ;;  %s1603_s12 = sld [smem:[#allocation18_spill]] }
 0x10a   : > { %522 = vmatpush.bf16.xpose.msra.mxu1 %v800_v54  ;;  %v789_v59 = vld [vmem:[%s1437_s27 + $0x20] sm:$0xff]  ;;  %v788_v61 = vld [vmem:[%s1437_s27 + $0x18] sm:$0xff]  ;;  %v787_v63 = vld [vmem:[%s1437_s27 + $0x10] sm:$0xff]  ;;  %s1605_s14 = sld [smem:[#allocation27_spill]] }
 0x10b   : > { %v797_v60 = vld [vmem:[%s1437_s27 + $0x60] sm:$0xff]  ;;  %v796_v62 = vld [vmem:[%s1437_s27 + $0x58] sm:$0xff]  ;;  %v795_v0 = vld [vmem:[%s1437_s27 + $0x50] sm:$0xff] }
 0x10c   : > { %v786_v1 = vld [vmem:[%s1437_s27 + $0x8] sm:$0xff]  ;;  %v785_v3 = vld [vmem:[%s1437_s27] sm:$0xff] }
 0x10d   : > { %v794_v2 = vld [vmem:[%s1437_s27 + $0x48] sm:$0xff]  ;;  %v793_v4 = vld [vmem:[%s1437_s27 + $0x40] sm:$0xff]  ;;  %s541_s27 = scalar_lea.sflag [#allocation5], %s280_s29 }
 0x10e   : > { %v784_v5 = vld [vmem:[#allocation2] sm:$0xff]  ;;  %v400_v6 = vld [vmem:[%s249_s15] sm:$0x3]  ;;  %s777_s21 = sshll.u32 %s1602_s30, 1 }
 0x10f   : > { %s801_s11 = sshll.u32 %s1603_s12, 3  ;;  %v402_v7 = vperm.slane %v400_v6, 0  ;;  %v403_v8 = vperm.slane %v400_v6, 1 }
 0x110   : > { %s553_s18 = sadd.s32 %s801_s11, %s777_s21  ;;  %s1606_s5 = smov %s1605_s14 }
 0x111   : > { %509 = vmatpush.bf16.xpose.msra.mxu0 %v791_v55  ;;  %s779_s10 = sshll.u32 %s553_s18, 2  ;;  %s1068_s7 = scalar_lea.hbm %s1606_s5, 64 }
 0x112   : > { %523 = vmatpush.bf16.xpose.msra.mxu1 %v799_v56  ;;  %s555_s20 = scalar_lea.hbm %s1605_s14, %s779_s10 }
 0x113   : > { %s558_s8 = sshll.u32 %s555_s20, 4  ;;  %s559_s8 = int_to_ptr.hbm [resolvable:$true] %s558_s8 }
 0x114   : > { %s1062_s9 = sshra.s32 %s559_s8, 4  ;;  %s1063_s9 = int_to_ptr.hbm [resolvable:$true] %s1062_s9 }
 0x115   : > { %s1064_s4 = scalar_lea.hbm %s1063_s9, 16  ;;  %p1069_p11 = scmp.lt.s32.totalorder %s1063_s9, %s1606_s5 }
 0x116   : > { %p1065_p4 = scmp.ne.s32.totalorder %s1063_s9, %s1064_s4  ;;  %p1070_p0 = scmp.lt.s32.totalorder %s1068_s7, %s1064_s4 }
 0x118   : > { %p1066_p6 = pnand %p1065_p4, %p1396_p8  ;;  %p1071_p12 = por %p1070_p0, %p1069_p11 }
 0x119   : > { %510 = vmatpush.bf16.xpose.msra.mxu0 %v790_v57 }
 0x11a   : > { %524 = vmatpush.bf16.xpose.msra.mxu1 %v798_v58  ;;  %p1067_p7 = pneg %p1066_p6 }
 0x11c   : > { %p1072_p1 = pnand %p1071_p12, %p1067_p7 }
 0x121   : > { %511 = vmatpush.bf16.xpose.msra.mxu0 %v789_v59 }
 0x122   : > { %525 = vmatpush.bf16.xpose.msra.mxu1 %v797_v60 }
 0x129   : > { %512 = vmatpush.bf16.xpose.msra.mxu0 %v788_v61 }
 0x12a   : > { %526 = vmatpush.bf16.xpose.msra.mxu1 %v796_v62 }
 0x131   : > { %513 = vmatpush.bf16.xpose.msra.mxu0 %v787_v63 }
 0x132   : > { %527 = vmatpush.bf16.xpose.msra.mxu1 %v795_v0 }
 0x139   : > { %514 = vmatpush.bf16.xpose.msra.mxu0 %v786_v1 }
 0x13a   : > { %528 = vmatpush.bf16.xpose.msra.mxu1 %v794_v2 }
 0x141   : > { %515 = vmatpush.bf16.xpose.msra.mxu0 %v785_v3 }
 0x142   : > { %529 = vmatpush.bf16.xpose.msra.mxu1 %v793_v4 }
 0x148   : > { %516 = vmatmul.bf16.vlgmr.msra.gmra.mxu0 %v784_v5 }
 0x149   : > { %530 = vmatmul.bf16.vlgmr.msra.gmra.mxu1 %v784_v5 }
 0x1c5   : > { %v517_v9 = vpop.f32.mrf.mxu0 }
 0x1c6   : > { %v531_v10 = vpop.f32.mrf.mxu1  ;;  %v518_v11 = vadd.f32 %v517_v9, %v402_v7 }
 0x1c7   : > { %v532_v12 = vadd.f32 %v531_v10, %v403_v8 }
 0x1c9   : > { %v536_v13 = vpack.c.bf16 %v532_v12, %v518_v11 }
 0x1cb   : > { %538 = vst [vmem:[%s1449_s26] sm:$0xff] %v536_v13 }
 0x1cd   : > { %v519_v14 = vpop.f32.mrf.mxu0 }
 0x1ce   : > { %v533_v15 = vpop.f32.mrf.mxu1  ;;  %v520_v16 = vadd.f32 %v519_v14, %v402_v7 }
 0x1cf   : > { %v534_v17 = vadd.f32 %v533_v15, %v403_v8 }
 0x1d1   : > { %v537_v18 = vpack.c.bf16 %v534_v17, %v520_v16 }
 0x1d3   : > { %539 = vst [vmem:[%s1449_s26 + $0x8] sm:$0xff] %v537_v18 }
 0x1d4   : > { %1075 = shalt.err (!%p1072_p1)
}
 0x1d5   : > { %s1204_s29 = smov 128   ;;  %s1205_s26 = smov 256  }
 0x1d6   : > { %s1206_s21 = smov 8  }
 0x1d7   : > { %813 = dma.vmem_to_hbm [thread:$0]  (%p1396_p8), %s557_s24, 256, %s559_s8, %s541_s27, %s1204_s29, %s1205_s26, %s1206_s21  }
 0x1d8 PF: > { %s1607_s11 = sld [smem:[#allocation13_spill]]  ;;  %p830_p3 = scmp.ge.s32.totalorder %s1198_s25, 2 }
 0x1da   : > { %p826_p5 = pnand %p830_p3, %p1406_p2 }
 0x1dc   : > { %p827_p9 = pneg %p826_p5 }
 0x1de   : > { %s573_s18 = sand.u32 1, %s1607_s11  }
 0x1df   : > { %s574_s3 = scalar_lea.sflag [#allocation5], %s573_s18 }
 0x1e0   : > { %1141 = dma.done.wait (%p827_p9), %s574_s3, 256  }
 0x1e1   : > { %1143 = vsyncadd (%p827_p9), %s574_s3, 4294967040  ;;  %s22_s25 = sadd.s32 1, %s1198_s25   ;;  %s1609_s12 = sld [smem:[#allocation14_spill]] }
 0x1e2   : > { %p1505_p10 = scmp.ge.s32.totalorder %s22_s25, 6   ;;  %s1610_s13 = sld [smem:[#allocation15_spill]] }
 0x1e3   : > { %s1611_s14 = sld [smem:[#allocation25_spill]]  ;;  %s1618_s15 = smov %s1162_s16 }
 0x1e4   : > { %s1612_s22 = sld [smem:[#allocation22_spill]]  ;;  %s1619_s16 = smov %s1166_s17 }
 0x1e5   : > { %s1613_s1 = sld [smem:[#allocation16_spill]]  ;;  %s1621_s18 = smov %s1174_s19 }
 0x1e6   : > { %s1614_s20 = sld [smem:[#allocation24_spill]]  ;;  %s1623_s21 = smov %s1190_s23 }
 0x1e7   : > { %s1615_s6 = sld [smem:[#allocation19_spill]] }
 0x1e8   : > { %s1616_s24 = sld [smem:[#allocation20_spill]] }
 0x1e9   : > { %s1617_s8 = sld [smem:[#allocation23_spill]] }
 0x1ea   : > { %s1620_s17 = smov %s1612_s22 }
 0x1eb   : > { %s1622_s19 = smov %s1613_s1  ;;  %21 = sbr.rel (!%p1505_p10) target bundleno = 15 (0xf), region = 105 }
 0x1ed   : > { %s1624_s22 = smov %s1615_s6 }
 0x1ee   : > { %s1625_s23 = smov %s1616_s24 }
 0x1ef   : > { %s1626_s24 = smov %s1617_s8 }
 0x1f0   :  { %580 = vsyncpa [#allocation4], 1 }
 0x1f1   :  { %582 = vsyncpa [#allocation4 + $0x1], 1 }
 0x1f2   :  { %583 = vsyncpa [#allocation7], 1 }
 0x1f3   :  { %585 = vsyncpa [#allocation7 + $0x1], 1 }
 0x1f4   :  { %586 = vsyncpa [#allocation5], 1 }
 0x1f5   :  { %588 = vsyncpa [#allocation5 + $0x1], 1 }

</bundles_post_ra>
